<compile_context>
chip_gen: v7x
topology: tpu7x:2x2x1
jax: 0.10.0
libtpu: 0.0.40
codegen_flags: <defaults>
</compile_context>

<pallas_src>
import functools

import jax
import jax.numpy as jnp
from jax import lax
from jax.experimental import pallas as pl
from jax.experimental.pallas import tpu as pltpu

NEG_SLOPE = 0.01  # torch.nn.LeakyReLU default negative_slope


def _down_kernel(ee0_ref, eo0_ref, oe0_ref, oo0_ref, ee1_ref, eo1_ref,
                 w_ref, b_ref, out_ref):
    # ee*/eo*/oe*/oo* refs: (1, th, Wo+1 or Wo, C) stride-2 parity views of the
    #                       padded input (rows 2h / 2h+1 / 2h+2, even/odd cols).
    # w_ref: (9, C, C)  -> w_ref[3*kh+kw][ci, co];  b_ref: (1, C) f32.
    # out_ref: (1, th, Wo, C)
    _, th, Wo, C = out_ref.shape

    ee0 = ee0_ref[...][0]
    eo0 = eo0_ref[...][0]
    oe0 = oe0_ref[...][0]
    oo0 = oo0_ref[...][0]
    ee1 = ee1_ref[...][0]
    eo1 = eo1_ref[...][0]

    # (kh, kw) -> (source view, static column offset).  Row parity / +1 row offset
    # is baked into which view is read; kw == 2 is a +1 static column slice.
    taps = [
        (ee0, 0), (eo0, 0), (ee0, 1),   # kh = 0 : kw = 0, 1, 2
        (oe0, 0), (oo0, 0), (oe0, 1),   # kh = 1
        (ee1, 0), (eo1, 0), (ee1, 1),   # kh = 2
    ]

    acc = jnp.zeros((th * Wo, C), jnp.float32)
    for k, (src, dc) in enumerate(taps):
        xs = src[:, dc:dc + Wo, :].reshape(th * Wo, C)
        acc = acc + jnp.dot(xs, w_ref[k], preferred_element_type=jnp.float32)

    acc = acc + b_ref[...].astype(jnp.float32)          # (1, C) broadcast over rows
    y = jnp.where(acc >= 0.0, acc, NEG_SLOPE * acc)     # LeakyReLU in f32
    out_ref[...] = y.reshape(1, th, Wo, C).astype(out_ref.dtype)


def _pick_row_tile(N, Ho, Wo, C, itemsize, target_rows, vmem_budget_bytes):
    """Output rows per grid step: big tiles (mem-bound lever), capped by VMEM."""
    th = max(1, min(Ho, max(1, target_rows // max(Wo, 1))))

    def vmem_need(t):
        in_b = 6 * t * (Wo + 1) * C * itemsize * 2     # 6 double-buffered input blocks
        out_b = t * Wo * C * 4 * 2                     # double-buffered output block
        acc_b = t * Wo * C * 4                         # f32 accumulator
        return in_b + out_b + acc_b

    while th > 1 and vmem_need(th) > vmem_budget_bytes:
        th = max(1, th // 2)
    if N == 1:
        # keep >= 2 grid steps so the v7x megacore can shard the grid
        th = min(th, max(1, pl.cdiv(Ho, 2)))
    return th


@functools.partial(jax.jit, static_argnames=("compute_dtype", "target_rows"))
def downsampling_pallas(x_nchw, weight, bias, *, compute_dtype=None, target_rows=1024):
    """x_nchw: (N, C, H, W); weight: (C, C, 3, 3) [PyTorch OIHW]; bias: (C,)."""
    N, C, H, W = x_nchw.shape
    Ho = (H + 2 - 3) // 2 + 1
    Wo = (W + 2 - 3) // 2 + 1
    out_dtype = x_nchw.dtype
    cdt = jnp.dtype(compute_dtype) if compute_dtype is not None else jnp.dtype(out_dtype)

    th = _pick_row_tile(N, Ho, Wo, C, cdt.itemsize, target_rows,
                        vmem_budget_bytes=12 * 2**20)
    Ho_pad = pl.cdiv(Ho, th) * th

    # ---- layout glue (fusible XLA ops, no 9x im2col): NCHW -> NHWC, zero-pad,
    # and split the padded image into the six stride-2 parity views the kernel taps.
    x = jnp.transpose(x_nchw, (0, 2, 3, 1)).astype(cdt)                 # (N, H, W, C)
    xp = jnp.pad(x, ((0, 0), (1, 2 * Ho_pad - H), (1, 2 * Wo - W), (0, 0)))
    # xp: (N, 2*Ho_pad + 1, 2*Wo + 1, C), xp[n, 2h+kh, 2w+kw, :] is patch element (kh, kw)
    ee0 = xp[:, 0:2 * Ho_pad:2,     0::2, :]   # rows 2h,   even cols  (kh=0, kw in {0,2})
    eo0 = xp[:, 0:2 * Ho_pad:2,     1::2, :]   # rows 2h,   odd  cols  (kh=0, kw=1)
    oe0 = xp[:, 1:2 * Ho_pad:2,     0::2, :]   # rows 2h+1, even cols  (kh=1, kw in {0,2})
    oo0 = xp[:, 1:2 * Ho_pad:2,     1::2, :]   # rows 2h+1, odd  cols  (kh=1, kw=1)
    ee1 = xp[:, 2:2 * Ho_pad + 1:2, 0::2, :]   # rows 2h+2, even cols  (kh=2, kw in {0,2})
    eo1 = xp[:, 2:2 * Ho_pad + 1:2, 1::2, :]   # rows 2h+2, odd  cols  (kh=2, kw=1)

    # weight OIHW -> (3*kh+kw, ci, co); bias stays in f32.
    w_stack = jnp.transpose(weight, (2, 3, 1, 0)).reshape(9, C, C).astype(cdt)
    b_row = bias.reshape(1, C).astype(jnp.float32)

    We = Wo + 1
    grid = (N, Ho_pad // th)

    def row_spec(wcols):
        return pl.BlockSpec((1, th, wcols, C), lambda n, i: (n, i, 0, 0))

    cost = pl.CostEstimate(
        flops=int(2 * N * Ho * Wo * 9 * C * C),
        transcendentals=0,
        bytes_accessed=int(3 * N * Ho_pad * (We + Wo) * C * cdt.itemsize
                           + 9 * C * C * cdt.itemsize
                           + N * Ho_pad * Wo * C * jnp.dtype(out_dtype).itemsize),
    )

    out_padded = pl.pallas_call(
        _down_kernel,
        out_shape=jax.ShapeDtypeStruct((N, Ho_pad, Wo, C), out_dtype),
        grid_spec=pltpu.PrefetchScalarGridSpec(
            num_scalar_prefetch=0,
            grid=grid,
            in_specs=[
                row_spec(We), row_spec(Wo),                      # ee0, eo0
                row_spec(We), row_spec(Wo),                      # oe0, oo0
                row_spec(We), row_spec(Wo),                      # ee1, eo1
                pl.BlockSpec((9, C, C), lambda n, i: (0, 0, 0)),  # weights (resident)
                pl.BlockSpec((1, C), lambda n, i: (0, 0)),        # bias
            ],
            out_specs=pl.BlockSpec((1, th, Wo, C), lambda n, i: (n, i, 0, 0)),
        ),
        compiler_params=pltpu.CompilerParams(
            dimension_semantics=("parallel", "parallel"),
        ),
        cost_estimate=cost,
    )(ee0, eo0, oe0, oo0, ee1, eo1, w_stack, b_row)

    out = out_padded[:, :Ho]                                    # drop padded rows
    return jnp.transpose(out, (0, 3, 1, 2)).astype(out_dtype)   # back to NCHW


def _reference(x_nchw, weight, bias):
    # Pure-JAX reference of the PyTorch forward (for verification only).
    y = lax.conv_general_dilated(
        x_nchw, weight,
        window_strides=(2, 2), padding=((1, 1), (1, 1)),
        dimension_numbers=("NCHW", "OIHW", "NCHW"),
    ) + bias.reshape(1, -1, 1, 1)
    return jnp.where(y >= 0.0, y, NEG_SLOPE * y)


if __name__ == "__main__":
    key = jax.random.PRNGKey(0)
    kx, kw_, kb = jax.random.split(key, 3)

    N, C, H, W = 2, 4, 16, 16
    x = jax.random.normal(kx, (N, C, H, W), dtype=jnp.float32)

    # Deterministic parameter init (shapes from nn.Conv2d(C, C, 3, 2, 1)).
    fan_in = C * 3 * 3
    bound = 1.0 / (fan_in ** 0.5)
    weight = jax.random.uniform(kw_, (C, C, 3, 3), jnp.float32, -bound, bound)
    bias = jax.random.uniform(kb, (C,), jnp.float32, -bound, bound)

    ref = _reference(x, weight, bias)

    # f32 path: exact semantics of the PyTorch module.
    out = jax.block_until_ready(downsampling_pallas(x, weight, bias))
    assert out.shape == (N, C, H // 2, W // 2), out.shape
    assert jnp.allclose(out, ref, atol=1e-5, rtol=1e-5), float(jnp.max(jnp.abs(out - ref)))

    # bf16 MXU path (recommended on v6e/v7x): bf16 operands, f32 accumulation.
    out_bf16 = jax.block_until_ready(
        downsampling_pallas(x, weight, bias, compute_dtype=jnp.bfloat16))
    assert jnp.allclose(out_bf16, ref, atol=5e-2, rtol=5e-2), \
        float(jnp.max(jnp.abs(out_bf16 - ref)))

    print("KERNEL_OK")
</pallas_src>

<mosaic_0001>
module attributes {stable_mosaic.version = 11 : i64} {
  func.func @_down_kernel(%arg0: i32, %arg1: i32, %arg2: memref<1x8x9x4xf32, #tpu.memory_space<vmem>>, %arg3: memref<1x8x8x4xf32, #tpu.memory_space<vmem>>, %arg4: memref<1x8x9x4xf32, #tpu.memory_space<vmem>>, %arg5: memref<1x8x8x4xf32, #tpu.memory_space<vmem>>, %arg6: memref<1x8x9x4xf32, #tpu.memory_space<vmem>>, %arg7: memref<1x8x8x4xf32, #tpu.memory_space<vmem>>, %arg8: memref<9x4x4xf32, #tpu.memory_space<vmem>>, %arg9: memref<1x4xf32, #tpu.memory_space<vmem>>, %arg10: memref<1x8x8x4xf32, #tpu.memory_space<vmem>>) attributes {dimension_semantics = [#tpu.dimension_semantics<parallel>, #tpu.dimension_semantics<parallel>], iteration_bounds = array<i64: 2, 1>, scalar_prefetch = 0 : i64, scratch_operands = 0 : i64, tpu.core_type = #tpu.core_type<tc>, window_params = [{transform_indices = @transform_0, window_bounds = array<i64: 1, 8, 9, 4>}, {transform_indices = @transform_1, window_bounds = array<i64: 1, 8, 8, 4>}, {transform_indices = @transform_2, window_bounds = array<i64: 1, 8, 9, 4>}, {transform_indices = @transform_3, window_bounds = array<i64: 1, 8, 8, 4>}, {transform_indices = @transform_4, window_bounds = array<i64: 1, 8, 9, 4>}, {transform_indices = @transform_5, window_bounds = array<i64: 1, 8, 8, 4>}, {pipeline_mode = #tpu.pipeline_mode<synchronous>, transform_indices = @transform_6, window_bounds = array<i64: 9, 4, 4>}, {pipeline_mode = #tpu.pipeline_mode<synchronous>, transform_indices = @transform_7, window_bounds = array<i64: 1, 4>}, {transform_indices = @transform_8, window_bounds = array<i64: 1, 8, 8, 4>}]} {
    %c0 = arith.constant 0 : index
    %c0_0 = arith.constant 0 : index
    %c0_1 = arith.constant 0 : index
    %c0_2 = arith.constant 0 : index
    %0 = vector.load %arg2[%c0, %c0_0, %c0_1, %c0_2] : memref<1x8x9x4xf32, #tpu.memory_space<vmem>>, vector<1x8x9x4xf32>
    %1 = vector.shape_cast %0 : vector<1x8x9x4xf32> to vector<8x9x4xf32>
    %c0_3 = arith.constant 0 : index
    %c0_4 = arith.constant 0 : index
    %c0_5 = arith.constant 0 : index
    %c0_6 = arith.constant 0 : index
    %2 = vector.load %arg3[%c0_3, %c0_4, %c0_5, %c0_6] : memref<1x8x8x4xf32, #tpu.memory_space<vmem>>, vector<1x8x8x4xf32>
    %3 = vector.shape_cast %2 : vector<1x8x8x4xf32> to vector<8x8x4xf32>
    %c0_7 = arith.constant 0 : index
    %c0_8 = arith.constant 0 : index
    %c0_9 = arith.constant 0 : index
    %c0_10 = arith.constant 0 : index
    %4 = vector.load %arg4[%c0_7, %c0_8, %c0_9, %c0_10] : memref<1x8x9x4xf32, #tpu.memory_space<vmem>>, vector<1x8x9x4xf32>
    %5 = vector.shape_cast %4 : vector<1x8x9x4xf32> to vector<8x9x4xf32>
    %c0_11 = arith.constant 0 : index
    %c0_12 = arith.constant 0 : index
    %c0_13 = arith.constant 0 : index
    %c0_14 = arith.constant 0 : index
    %6 = vector.load %arg5[%c0_11, %c0_12, %c0_13, %c0_14] : memref<1x8x8x4xf32, #tpu.memory_space<vmem>>, vector<1x8x8x4xf32>
    %7 = vector.shape_cast %6 : vector<1x8x8x4xf32> to vector<8x8x4xf32>
    %c0_15 = arith.constant 0 : index
    %c0_16 = arith.constant 0 : index
    %c0_17 = arith.constant 0 : index
    %c0_18 = arith.constant 0 : index
    %8 = vector.load %arg6[%c0_15, %c0_16, %c0_17, %c0_18] : memref<1x8x9x4xf32, #tpu.memory_space<vmem>>, vector<1x8x9x4xf32>
    %9 = vector.shape_cast %8 : vector<1x8x9x4xf32> to vector<8x9x4xf32>
    %c0_19 = arith.constant 0 : index
    %c0_20 = arith.constant 0 : index
    %c0_21 = arith.constant 0 : index
    %c0_22 = arith.constant 0 : index
    %10 = vector.load %arg7[%c0_19, %c0_20, %c0_21, %c0_22] : memref<1x8x8x4xf32, #tpu.memory_space<vmem>>, vector<1x8x8x4xf32>
    %11 = vector.shape_cast %10 : vector<1x8x8x4xf32> to vector<8x8x4xf32>
    %cst = arith.constant 0.000000e+00 : f32
    %12 = vector.broadcast %cst : f32 to vector<64x4xf32>
    %13 = vector.extract_strided_slice %1 {offsets = [0, 0, 0], sizes = [8, 8, 4], strides = [1, 1, 1]} : vector<8x9x4xf32> to vector<8x8x4xf32>
    %14 = vector.shape_cast %13 : vector<8x8x4xf32> to vector<64x4xf32>
    %c0_23 = arith.constant 0 : index
    %c0_24 = arith.constant 0 : index
    %c0_25 = arith.constant 0 : index
    %15 = vector.load %arg8[%c0_23, %c0_24, %c0_25] : memref<9x4x4xf32, #tpu.memory_space<vmem>>, vector<1x4x4xf32>
    %16 = vector.shape_cast %15 : vector<1x4x4xf32> to vector<4x4xf32>
    %cst_26 = arith.constant dense<0.000000e+00> : vector<64x4xf32>
    %17 = tpu.matmul %14, %16, %cst_26 {dimension_numbers = #tpu.dot_dimension_numbers<[1], [0], [0], [1], [0, 0, 1, 1], [], []>} : vector<64x4xf32>, vector<4x4xf32>, vector<64x4xf32> -> vector<64x4xf32>
    %18 = arith.addf %12, %17 : vector<64x4xf32>
    %19 = vector.shape_cast %3 : vector<8x8x4xf32> to vector<64x4xf32>
    %c1 = arith.constant 1 : index
    %c0_27 = arith.constant 0 : index
    %c0_28 = arith.constant 0 : index
    %20 = vector.load %arg8[%c1, %c0_27, %c0_28] : memref<9x4x4xf32, #tpu.memory_space<vmem>>, vector<1x4x4xf32>
    %21 = vector.shape_cast %20 : vector<1x4x4xf32> to vector<4x4xf32>
    %cst_29 = arith.constant dense<0.000000e+00> : vector<64x4xf32>
    %22 = tpu.matmul %19, %21, %cst_29 {dimension_numbers = #tpu.dot_dimension_numbers<[1], [0], [0], [1], [0, 0, 1, 1], [], []>} : vector<64x4xf32>, vector<4x4xf32>, vector<64x4xf32> -> vector<64x4xf32>
    %23 = arith.addf %18, %22 : vector<64x4xf32>
    %24 = vector.extract_strided_slice %1 {offsets = [0, 1, 0], sizes = [8, 8, 4], strides = [1, 1, 1]} : vector<8x9x4xf32> to vector<8x8x4xf32>
    %25 = vector.shape_cast %24 : vector<8x8x4xf32> to vector<64x4xf32>
    %c2 = arith.constant 2 : index
    %c0_30 = arith.constant 0 : index
    %c0_31 = arith.constant 0 : index
    %26 = vector.load %arg8[%c2, %c0_30, %c0_31] : memref<9x4x4xf32, #tpu.memory_space<vmem>>, vector<1x4x4xf32>
    %27 = vector.shape_cast %26 : vector<1x4x4xf32> to vector<4x4xf32>
    %cst_32 = arith.constant dense<0.000000e+00> : vector<64x4xf32>
    %28 = tpu.matmul %25, %27, %cst_32 {dimension_numbers = #tpu.dot_dimension_numbers<[1], [0], [0], [1], [0, 0, 1, 1], [], []>} : vector<64x4xf32>, vector<4x4xf32>, vector<64x4xf32> -> vector<64x4xf32>
    %29 = arith.addf %23, %28 : vector<64x4xf32>
    %30 = vector.extract_strided_slice %5 {offsets = [0, 0, 0], sizes = [8, 8, 4], strides = [1, 1, 1]} : vector<8x9x4xf32> to vector<8x8x4xf32>
    %31 = vector.shape_cast %30 : vector<8x8x4xf32> to vector<64x4xf32>
    %c3 = arith.constant 3 : index
    %c0_33 = arith.constant 0 : index
    %c0_34 = arith.constant 0 : index
    %32 = vector.load %arg8[%c3, %c0_33, %c0_34] : memref<9x4x4xf32, #tpu.memory_space<vmem>>, vector<1x4x4xf32>
    %33 = vector.shape_cast %32 : vector<1x4x4xf32> to vector<4x4xf32>
    %cst_35 = arith.constant dense<0.000000e+00> : vector<64x4xf32>
    %34 = tpu.matmul %31, %33, %cst_35 {dimension_numbers = #tpu.dot_dimension_numbers<[1], [0], [0], [1], [0, 0, 1, 1], [], []>} : vector<64x4xf32>, vector<4x4xf32>, vector<64x4xf32> -> vector<64x4xf32>
    %35 = arith.addf %29, %34 : vector<64x4xf32>
    %36 = vector.shape_cast %7 : vector<8x8x4xf32> to vector<64x4xf32>
    %c4 = arith.constant 4 : index
    %c0_36 = arith.constant 0 : index
    %c0_37 = arith.constant 0 : index
    %37 = vector.load %arg8[%c4, %c0_36, %c0_37] : memref<9x4x4xf32, #tpu.memory_space<vmem>>, vector<1x4x4xf32>
    %38 = vector.shape_cast %37 : vector<1x4x4xf32> to vector<4x4xf32>
    %cst_38 = arith.constant dense<0.000000e+00> : vector<64x4xf32>
    %39 = tpu.matmul %36, %38, %cst_38 {dimension_numbers = #tpu.dot_dimension_numbers<[1], [0], [0], [1], [0, 0, 1, 1], [], []>} : vector<64x4xf32>, vector<4x4xf32>, vector<64x4xf32> -> vector<64x4xf32>
    %40 = arith.addf %35, %39 : vector<64x4xf32>
    %41 = vector.extract_strided_slice %5 {offsets = [0, 1, 0], sizes = [8, 8, 4], strides = [1, 1, 1]} : vector<8x9x4xf32> to vector<8x8x4xf32>
    %42 = vector.shape_cast %41 : vector<8x8x4xf32> to vector<64x4xf32>
    %c5 = arith.constant 5 : index
    %c0_39 = arith.constant 0 : index
    %c0_40 = arith.constant 0 : index
    %43 = vector.load %arg8[%c5, %c0_39, %c0_40] : memref<9x4x4xf32, #tpu.memory_space<vmem>>, vector<1x4x4xf32>
    %44 = vector.shape_cast %43 : vector<1x4x4xf32> to vector<4x4xf32>
    %cst_41 = arith.constant dense<0.000000e+00> : vector<64x4xf32>
    %45 = tpu.matmul %42, %44, %cst_41 {dimension_numbers = #tpu.dot_dimension_numbers<[1], [0], [0], [1], [0, 0, 1, 1], [], []>} : vector<64x4xf32>, vector<4x4xf32>, vector<64x4xf32> -> vector<64x4xf32>
    %46 = arith.addf %40, %45 : vector<64x4xf32>
    %47 = vector.extract_strided_slice %9 {offsets = [0, 0, 0], sizes = [8, 8, 4], strides = [1, 1, 1]} : vector<8x9x4xf32> to vector<8x8x4xf32>
    %48 = vector.shape_cast %47 : vector<8x8x4xf32> to vector<64x4xf32>
    %c6 = arith.constant 6 : index
    %c0_42 = arith.constant 0 : index
    %c0_43 = arith.constant 0 : index
    %49 = vector.load %arg8[%c6, %c0_42, %c0_43] : memref<9x4x4xf32, #tpu.memory_space<vmem>>, vector<1x4x4xf32>
    %50 = vector.shape_cast %49 : vector<1x4x4xf32> to vector<4x4xf32>
    %cst_44 = arith.constant dense<0.000000e+00> : vector<64x4xf32>
    %51 = tpu.matmul %48, %50, %cst_44 {dimension_numbers = #tpu.dot_dimension_numbers<[1], [0], [0], [1], [0, 0, 1, 1], [], []>} : vector<64x4xf32>, vector<4x4xf32>, vector<64x4xf32> -> vector<64x4xf32>
    %52 = arith.addf %46, %51 : vector<64x4xf32>
    %53 = vector.shape_cast %11 : vector<8x8x4xf32> to vector<64x4xf32>
    %c7 = arith.constant 7 : index
    %c0_45 = arith.constant 0 : index
    %c0_46 = arith.constant 0 : index
    %54 = vector.load %arg8[%c7, %c0_45, %c0_46] : memref<9x4x4xf32, #tpu.memory_space<vmem>>, vector<1x4x4xf32>
    %55 = vector.shape_cast %54 : vector<1x4x4xf32> to vector<4x4xf32>
    %cst_47 = arith.constant dense<0.000000e+00> : vector<64x4xf32>
    %56 = tpu.matmul %53, %55, %cst_47 {dimension_numbers = #tpu.dot_dimension_numbers<[1], [0], [0], [1], [0, 0, 1, 1], [], []>} : vector<64x4xf32>, vector<4x4xf32>, vector<64x4xf32> -> vector<64x4xf32>
    %57 = arith.addf %52, %56 : vector<64x4xf32>
    %58 = vector.extract_strided_slice %9 {offsets = [0, 1, 0], sizes = [8, 8, 4], strides = [1, 1, 1]} : vector<8x9x4xf32> to vector<8x8x4xf32>
    %59 = vector.shape_cast %58 : vector<8x8x4xf32> to vector<64x4xf32>
    %c8 = arith.constant 8 : index
    %c0_48 = arith.constant 0 : index
    %c0_49 = arith.constant 0 : index
    %60 = vector.load %arg8[%c8, %c0_48, %c0_49] : memref<9x4x4xf32, #tpu.memory_space<vmem>>, vector<1x4x4xf32>
    %61 = vector.shape_cast %60 : vector<1x4x4xf32> to vector<4x4xf32>
    %cst_50 = arith.constant dense<0.000000e+00> : vector<64x4xf32>
    %62 = tpu.matmul %59, %61, %cst_50 {dimension_numbers = #tpu.dot_dimension_numbers<[1], [0], [0], [1], [0, 0, 1, 1], [], []>} : vector<64x4xf32>, vector<4x4xf32>, vector<64x4xf32> -> vector<64x4xf32>
    %63 = arith.addf %57, %62 : vector<64x4xf32>
    %c0_51 = arith.constant 0 : index
    %c0_52 = arith.constant 0 : index
    %64 = vector.load %arg9[%c0_51, %c0_52] : memref<1x4xf32, #tpu.memory_space<vmem>>, vector<1x4xf32>
    %65 = vector.broadcast %64 : vector<1x4xf32> to vector<64x4xf32>
    %66 = arith.addf %63, %65 : vector<64x4xf32>
    %cst_53 = arith.constant 0.000000e+00 : f32
    %67 = vector.broadcast %cst_53 : f32 to vector<64x4xf32>
    %68 = arith.cmpf oge, %66, %67 : vector<64x4xf32>
    %cst_54 = arith.constant 0.00999999977 : f32
    %69 = vector.broadcast %cst_54 : f32 to vector<64x4xf32>
    %70 = arith.mulf %69, %66 : vector<64x4xf32>
    %71 = arith.select %68, %66, %70 : vector<64x4xi1>, vector<64x4xf32>
    %72 = vector.shape_cast %71 : vector<64x4xf32> to vector<1x8x8x4xf32>
    %c0_55 = arith.constant 0 : index
    %c0_56 = arith.constant 0 : index
    %c0_57 = arith.constant 0 : index
    %c0_58 = arith.constant 0 : index
    %73 = vector.load %arg10[%c0_55, %c0_56, %c0_57, %c0_58] : memref<1x8x8x4xf32, #tpu.memory_space<vmem>>, vector<1x8x8x4xf32>
    tpu.vector_store %arg10[%c0_55, %c0_56, %c0_57, %c0_58], %72 {strides = array<i32>} : memref<1x8x8x4xf32, #tpu.memory_space<vmem>>, vector<1x8x8x4xf32>,
    return
  }
  func.func @transform_0(%arg0: i32, %arg1: i32) -> (i32, i32, i32, i32) {
    %c0_i32 = arith.constant 0 : i32
    %c0_i32_0 = arith.constant 0 : i32
    %c0_i32_1 = arith.constant 0 : i32
    return %arg0, %arg1, %c0_i32, %c0_i32_0 : i32, i32, i32, i32
  }
  func.func @transform_1(%arg0: i32, %arg1: i32) -> (i32, i32, i32, i32) {
    %c0_i32 = arith.constant 0 : i32
    %c0_i32_0 = arith.constant 0 : i32
    %c0_i32_1 = arith.constant 0 : i32
    return %arg0, %arg1, %c0_i32, %c0_i32_0 : i32, i32, i32, i32
  }
  func.func @transform_2(%arg0: i32, %arg1: i32) -> (i32, i32, i32, i32) {
    %c0_i32 = arith.constant 0 : i32
    %c0_i32_0 = arith.constant 0 : i32
    %c0_i32_1 = arith.constant 0 : i32
    return %arg0, %arg1, %c0_i32, %c0_i32_0 : i32, i32, i32, i32
  }
  func.func @transform_3(%arg0: i32, %arg1: i32) -> (i32, i32, i32, i32) {
    %c0_i32 = arith.constant 0 : i32
    %c0_i32_0 = arith.constant 0 : i32
    %c0_i32_1 = arith.constant 0 : i32
    return %arg0, %arg1, %c0_i32, %c0_i32_0 : i32, i32, i32, i32
  }
  func.func @transform_4(%arg0: i32, %arg1: i32) -> (i32, i32, i32, i32) {
    %c0_i32 = arith.constant 0 : i32
    %c0_i32_0 = arith.constant 0 : i32
    %c0_i32_1 = arith.constant 0 : i32
    return %arg0, %arg1, %c0_i32, %c0_i32_0 : i32, i32, i32, i32
  }
  func.func @transform_5(%arg0: i32, %arg1: i32) -> (i32, i32, i32, i32) {
    %c0_i32 = arith.constant 0 : i32
    %c0_i32_0 = arith.constant 0 : i32
    %c0_i32_1 = arith.constant 0 : i32
    return %arg0, %arg1, %c0_i32, %c0_i32_0 : i32, i32, i32, i32
  }
  func.func @transform_6(%arg0: i32, %arg1: i32) -> (i32, i32, i32) {
    %c0_i32 = arith.constant 0 : i32
    %c0_i32_0 = arith.constant 0 : i32
    %c0_i32_1 = arith.constant 0 : i32
    %c0_i32_2 = arith.constant 0 : i32
    return %c0_i32, %c0_i32_0, %c0_i32_1 : i32, i32, i32
  }
  func.func @transform_7(%arg0: i32, %arg1: i32) -> (i32, i32) {
    %c0_i32 = arith.constant 0 : i32
    %c0_i32_0 = arith.constant 0 : i32
    %c0_i32_1 = arith.constant 0 : i32
    return %c0_i32, %c0_i32_0 : i32, i32
  }
  func.func @transform_8(%arg0: i32, %arg1: i32) -> (i32, i32, i32, i32) {
    %c0_i32 = arith.constant 0 : i32
    %c0_i32_0 = arith.constant 0 : i32
    %c0_i32_1 = arith.constant 0 : i32
    return %arg0, %arg1, %c0_i32, %c0_i32_0 : i32, i32, i32, i32
  }
}

</mosaic_0001>

<bundles_post_ra>
// kernel: downsampling_pallas.1
= control target key start
LH: loop header
LB: loop body
LE: loop exit
PB: predicated region body
PF: predicated region fallthrough
CT: control target
= control target key end

     0   :  { %s2659_s27 = smov 0   ;;  %s2661_s28 = smov 0   ;;  %s3044_s0 = inlined_call_operand.vmem [shape: f32[2,8,9,4], index: 0, kind: input, shape index: {}]   ;;  %s3045_s1 = inlined_call_operand.vmem [shape: f32[2,8,8,4], index: 1, kind: input, shape index: {}]   ;;  %s3046_s2 = inlined_call_operand.vmem [shape: f32[2,8,9,4], index: 2, kind: input, shape index: {}]   ;;  %s3047_s3 = inlined_call_operand.vmem [shape: f32[2,8,8,4], index: 3, kind: input, shape index: {}]   ;;  %s3048_s4 = inlined_call_operand.vmem [shape: f32[2,8,9,4], index: 4, kind: input, shape index: {}]   ;;  %s3049_s5 = inlined_call_operand.vmem [shape: f32[2,8,8,4], index: 5, kind: input, shape index: {}]   ;;  %s3050_s6 = inlined_call_operand.vmem [shape: f32[9,4,4], index: 6, kind: input, shape index: {}]   ;;  %s3051_s7 = inlined_call_operand.vmem [shape: f32[1,4], index: 7, kind: input, shape index: {}]   ;;  %s3052_s8 = inlined_call_operand.vmem [shape: f32[2,8,8,4], index: 8, kind: output, shape index: {}]  }
   0x1   :  { %s2663_s29 = smov 0  }
   0x2 LB: > { %s30_s30 = sadd.s32 1, %s2608_s28  ;;  %p2179_p0 = scmp.ge.s32.totalorder %s2612_s29, 1  ;;  %s2612_s29 = sphi %s2663_s29, %s18_s29   ;;  %s2608_s28 = sphi %s2661_s28, %s3054_s28   ;;  %s2604_s27 = sphi %s2659_s27, %s3053_s27  }
   0x3   : > { %p32_p1 = scmp.ge.s32.totalorder %s30_s30, 2  ;;  %p371_p2 = scmp.lt.s32.totalorder %s2612_s29, 3 }
   0x5   : > { %s3056_s30 = smov (%p32_p1, %s30_s30), 0  ;;  %p372_p3 = pnand %p2179_p0, %p371_p2 }
   0x6   : > { %v2194_v0 = vld [vmem:[%s3050_s6 + $0x4] sm:$0xf] (!%p372_p3)  ;;  %vm634_vm0 = vcmask (!%p372_p3), 1043456   ;;  %v2683_v1 = vld [vmem:[%s3050_s6 + $0x10] sm:$0xf] (!%p372_p3)  ;;  %p462_p4 = scmp.lt.s32.totalorder (!%p372_p3), %s2604_s27, 1 }
   0x7   : > { %375 = sbr.rel (%p372_p3) target bundleno = 310 (0x136), region = 52  ;;  %2374 = vmatprep.subr.msk.mxu1 (!%p372_p3), %vm634_vm0, %v2194_v0  ;;  %2430 = vmatprep.subr.msk.mxu0 (!%p372_p3), %vm634_vm0, %v2683_v1  ;;  %v606_v2 = vld [vmem:[%s3050_s6] sm:$0xf] (!%p372_p3)  ;;  %v2243_v3 = vld [vmem:[%s3050_s6 + $0x14] sm:$0xf] (!%p372_p3)  ;;  %vm609_vm1 = vcmask (!%p372_p3), 31744  }
   0x8   : > { %2375 = vmatpush3.msk.msra.mxu1 (!%p372_p3), %vm634_vm0, %v2194_v0  ;;  %2431 = vmatpush3.msk.msra.mxu0 (!%p372_p3), %vm634_vm0, %v2683_v1  ;;  %v2253_v8 = vld [vmem:[%s3050_s6 + $0x18] sm:$0xf] (!%p372_p3)  ;;  %vm883_vm2 = vcmask (!%p372_p3), 1046528   ;;  %v2743_v15 = vld [vmem:[%s3050_s6 + $0x8] sm:$0xf] (!%p372_p3) }
   0x9   : > { %2388 = vmatprep.subr.msk.mxu1 (!%p372_p3), %vm634_vm0, %v606_v2  ;;  %2444 = vmatprep.subr.msk.mxu0 (!%p372_p3), %vm634_vm0, %v2243_v3  ;;  %v2790_v37 = vld [vmem:[%s3050_s6 + $0x1c] sm:$0xf] (!%p372_p3)  ;;  %v2223_v60 = vld [vmem:[%s3050_s6 + $0xc] sm:$0xf] (!%p372_p3) }
   0xe   : > { %s3058_s27 = smov (!%p462_p4, %s2604_s27), 1 }
   0xf   : > { %s2699_s17 = sshll.u32 %s3058_s27, 7  ;;  %s2701_s18 = sshll.u32 %s3058_s27, 6 }
  0x10   : > { %s2707_s21 = scalar_lea.vmem %s3045_s1, %s2701_s18  ;;  %s2713_s24 = scalar_lea.vmem %s3046_s2, %s2699_s17 }
  0x11   : > { %v550_v4 = vld [vmem:[%s2707_s21] sm:$0xff]  ;;  %v551_v5 = vld [vmem:[%s2707_s21 + $0x8] sm:$0xff]  ;;  %s2722_s27 = scalar_lea.vmem %s3047_s3, %s2701_s18  ;;  %v552_v6 = vld [vmem:[%s2707_s21 + $0x10] sm:$0xff]  ;;  %s2782_s15 = scalar_lea.vmem %s3044_s0, %s2699_s17 }
  0x12   : > { %2376 = vmatprep.mubr.msk.f32.mxu1 %vm609_vm1, %v550_v4  ;;  %v2726_v7 = vld [vmem:[%s2713_s24] sm:$0xff]  ;;  %v575_v10 = vld [vmem:[%s2722_s27 + $0x8] sm:$0xff]  ;;  %v576_v11 = vld [vmem:[%s2722_s27 + $0x10] sm:$0xff]  ;;  %s2912_s10 = scalar_lea.vmem %s3049_s5, %s2701_s18  ;;  %s3017_s14 = scalar_lea.vmem %s3052_s8, %s2701_s18 }
  0x13   : > { %v574_v9 = vld [vmem:[%s2722_s27] sm:$0xff]  ;;  %2377 = vmatmul.mubr.msk.f32.vlgmr.msra.gmra.mrb[0].mxu1 %vm609_vm1, %v551_v5  ;;  %v1334_v12 = vrot.slane %v2726_v7, 1  ;;  %v553_v13 = vld [vmem:[%s2707_s21 + $0x18] sm:$0xff]  ;;  %v559_v14 = vld [vmem:[%s2713_s24 + $0x8] sm:$0x1] }
  0x14   : > { %2432 = vmatprep.mubr.msk.f32.mxu0 %vm609_vm1, %v574_v9  ;;  %2389 = vmatpush3.msk.msra.mxu1 %vm634_vm0, %v606_v2  ;;  %v554_v16 = vld [vmem:[%s2707_s21 + $0x20] sm:$0xff]  ;;  %v1335_v17 = vrot.slane %v559_v14, 1  ;;  %v2749_v18 = vld [vmem:[%s2713_s24 + $0x10] sm:$0xff]  ;;  %v561_v19 = vld [vmem:[%s2713_s24 + $0x18] sm:$0x1] }
  0x15   : > { %2433 = vmatmul.mubr.msk.f32.vlgmr.msra.gmra.mrb[0].mxu0 %vm609_vm1, %v575_v10  ;;  %2379 = vmatprep.mubr.msk.f32.mxu1 %vm609_vm1, %v552_v6  ;;  %v577_v20 = vld [vmem:[%s2722_s27 + $0x18] sm:$0xff]  ;;  %v1337_v21 = vrot.slane %v2749_v18, 1  ;;  %v1338_v22 = vrot.slane %v561_v19, 1  ;;  %v2757_v23 = vld [vmem:[%s2713_s24 + $0x20] sm:$0xff]  ;;  %v563_v24 = vld [vmem:[%s2713_s24 + $0x28] sm:$0x1] }
  0x16   : > { %2445 = vmatpush3.msk.msra.mxu0 %vm634_vm0, %v2243_v3  ;;  %2435 = vmatprep.mubr.msk.f32.mxu0 %vm609_vm1, %v576_v11  ;;  %v1336_v25 = vsel %vm883_vm2, %v1334_v12, %v1335_v17  ;;  %v1340_v26 = vrot.slane %v2757_v23, 1  ;;  %v1341_v27 = vrot.slane %v563_v24, 1  ;;  %v2765_v28 = vld [vmem:[%s2713_s24 + $0x30] sm:$0xff]  ;;  %v565_v29 = vld [vmem:[%s2713_s24 + $0x38] sm:$0x1]  ;;  %v555_v30 = vld [vmem:[%s2707_s21 + $0x28] sm:$0xff] }
  0x17   : > { %2380 = vmatmul.mubr.msk.f32.gmra.mrb[2].mxu1 %vm609_vm1, %v553_v13  ;;  %2458 = vmatprep.subr.msk.mxu0 %vm634_vm0, %v2253_v8  ;;  %v2773_v31 = vld [vmem:[%s2713_s24 + $0x40] sm:$0xff]  ;;  %v567_v32 = vld [vmem:[%s2713_s24 + $0x48] sm:$0x1]  ;;  %v556_v33 = vld [vmem:[%s2707_s21 + $0x30] sm:$0xff]  ;;  %v1339_v34 = vsel %vm883_vm2, %v1337_v21, %v1338_v22  ;;  %v1343_v35 = vrot.slane %v2765_v28, 1  ;;  %v1344_v36 = vrot.slane %v565_v29, 1 }
  0x18   : > { %2382 = vmatprep.mubr.msk.f32.mxu1 %vm609_vm1, %v554_v16  ;;  %2402 = vmatprep.subr.msk.mxu1 %vm634_vm0, %v2743_v15  ;;  %v1342_v38 = vsel %vm883_vm2, %v1340_v26, %v1341_v27  ;;  %v1346_v39 = vrot.slane %v2773_v31, 1  ;;  %v1347_v40 = vrot.slane %v567_v32, 1  ;;  %v2796_v41 = vld [vmem:[%s2713_s24 + $0x50] sm:$0xff]  ;;  %v569_v42 = vld [vmem:[%s2713_s24 + $0x58] sm:$0x1]  ;;  %v2802_v44 = vld [vmem:[%s2713_s24 + $0x60] sm:$0xff] }
  0x19   : > { %2436 = vmatmul.mubr.msk.f32.gmra.mrb[2].mxu0 %vm609_vm1, %v577_v20  ;;  %v557_v43 = vld [vmem:[%s2707_s21 + $0x38] sm:$0xff]  ;;  %v571_v45 = vld [vmem:[%s2713_s24 + $0x68] sm:$0x1]  ;;  %v534_v46 = vld [vmem:[%s2782_s15] sm:$0xff]  ;;  %v1345_v47 = vsel %vm883_vm2, %v1343_v35, %v1344_v36  ;;  %v1349_v48 = vrot.slane %v2796_v41, 1  ;;  %v1350_v49 = vrot.slane %v569_v42, 1 }
  0x1a   : > { %2446 = vmatprep.mubr.msk.f32.mxu0 %vm609_vm1, %v1336_v25  ;;  %v1348_v50 = vsel %vm883_vm2, %v1346_v39, %v1347_v40  ;;  %v1352_v51 = vrot.slane %v2802_v44, 1  ;;  %v1353_v52 = vrot.slane %v571_v45, 1  ;;  %v2815_v53 = vld [vmem:[%s2713_s24 + $0x70] sm:$0xff]  ;;  %v573_v54 = vld [vmem:[%s2713_s24 + $0x78] sm:$0x1]  ;;  %v538_v56 = vld [vmem:[%s2782_s15 + $0x20] sm:$0xff]  ;;  %s2836_s24 = scalar_lea.vmem %s3048_s4, %s2699_s17 }
  0x1b   : > { %2383 = vmatmul.mubr.msk.f32.gmra.mrb[4].mxu1 %vm609_vm1, %v555_v30  ;;  %v536_v55 = vld [vmem:[%s2782_s15 + $0x10] sm:$0xff]  ;;  %v1351_v57 = vsel %vm883_vm2, %v1349_v48, %v1350_v49  ;;  %v1355_v58 = vrot.slane %v2815_v53, 1  ;;  %v1356_v59 = vrot.slane %v573_v54, 1  ;;  %v542_v63 = vld [vmem:[%s2782_s15 + $0x40] sm:$0xff]  ;;  %v535_v2 = vld [vmem:[%s2782_s15 + $0x8] sm:$0x1] }
  0x1c   : > { %2385 = vmatprep.mubr.msk.f32.mxu1 %vm609_vm1, %v556_v33  ;;  %v1354_v61 = vsel %vm883_vm2, %v1352_v51, %v1353_v52  ;;  %v540_v62 = vld [vmem:[%s2782_s15 + $0x30] sm:$0xff]  ;;  %v2850_v3 = vld [vmem:[%s2836_s24] sm:$0xff]  ;;  %v884_v5 = vrot.slane %v534_v46, 1  ;;  %v537_v9 = vld [vmem:[%s2782_s15 + $0x18] sm:$0x1]  ;;  %v887_v13 = vrot.slane %v536_v55, 1 }
  0x1d   : > { %2447 = vmatmul.mubr.msk.f32.vlgmr.msra.gmra.mrb[0].mxu0 %vm609_vm1, %v1339_v34  ;;  %v1357_v0 = vsel %vm883_vm2, %v1355_v58, %v1356_v59  ;;  %v544_v4 = vld [vmem:[%s2782_s15 + $0x50] sm:$0xff]  ;;  %v546_v6 = vld [vmem:[%s2782_s15 + $0x60] sm:$0xff]  ;;  %v539_v11 = vld [vmem:[%s2782_s15 + $0x28] sm:$0x1]  ;;  %v890_v17 = vrot.slane %v538_v56, 1  ;;  %v893_v26 = vrot.slane %v540_v62, 1 }
  0x1e   : > { %2459 = vmatpush3.msk.msra.mxu0 %vm634_vm0, %v2253_v8  ;;  %2449 = vmatprep.mubr.msk.f32.mxu0 %vm609_vm1, %v1342_v38  ;;  %v885_v8 = vrot.slane %v535_v2, 1  ;;  %v2860_v10 = vld [vmem:[%s2836_s24 + $0x10] sm:$0xff]  ;;  %v2865_v12 = vld [vmem:[%s2836_s24 + $0x20] sm:$0xff]  ;;  %v891_v20 = vrot.slane %v539_v11, 1  ;;  %v541_v21 = vld [vmem:[%s2782_s15 + $0x38] sm:$0x1] }
  0x1f   : > { %2386 = vmatmul.mubr.msk.f32.gmra.mrb[6].mxu1 %vm609_vm1, %v557_v43  ;;  %2472 = vmatprep.subr.msk.mxu0 %vm634_vm0, %v2790_v37  ;;  %v548_v14 = vld [vmem:[%s2782_s15 + $0x70] sm:$0xff]  ;;  %v2273_v16 = vld [vmem:[%s3050_s6 + $0x20] sm:$0xf]  ;;  %v543_v24 = vld [vmem:[%s2782_s15 + $0x48] sm:$0x1]  ;;  %v894_v29 = vrot.slane %v541_v21, 1 }
  0x20   : > { %2390 = vmatprep.mubr.msk.f32.mxu1 %vm609_vm1, %v534_v46  ;;  %v886_v19 = vsel %vm883_vm2, %v884_v5, %v885_v8  ;;  %v2881_v22 = vld [vmem:[%s2836_s24 + $0x30] sm:$0xff]  ;;  %v2886_v25 = vld [vmem:[%s2836_s24 + $0x40] sm:$0xff]  ;;  %v896_v30 = vrot.slane %v542_v63, 1  ;;  %v892_v32 = vsel %vm883_vm2, %v890_v17, %v891_v20  ;;  %v897_v33 = vrot.slane %v543_v24, 1  ;;  %v545_v34 = vld [vmem:[%s2782_s15 + $0x58] sm:$0x1] }
  0x21   : > { %2450 = vmatmul.mubr.msk.f32.gmra.mrb[2].mxu0 %vm609_vm1, %v1345_v47  ;;  %v2898_v35 = vld [vmem:[%s2836_s24 + $0x50] sm:$0xff]  ;;  %v547_v36 = vld [vmem:[%s2782_s15 + $0x68] sm:$0x1]  ;;  %v899_v38 = vrot.slane %v544_v4, 1  ;;  %v895_v39 = vsel %vm883_vm2, %v893_v26, %v894_v29  ;;  %v900_v40 = vrot.slane %v545_v34, 1  ;;  %v902_v42 = vrot.slane %v546_v6, 1 }
  0x22   : > { %2452 = vmatprep.mubr.msk.f32.mxu0 %vm609_vm1, %v1348_v50  ;;  %v898_v43 = vsel %vm883_vm2, %v896_v30, %v897_v33  ;;  %v903_v45 = vrot.slane %v547_v36, 1  ;;  %v549_v46 = vld [vmem:[%s2782_s15 + $0x78] sm:$0x1]  ;;  %v2923_v47 = vld [vmem:[%s2836_s24 + $0x70] sm:$0xff]  ;;  %v598_v48 = vld [vmem:[%s2912_s10] sm:$0xff]  ;;  %v905_v49 = vrot.slane %v548_v14, 1 }
  0x23   : > { %2391 = vmatmul.mubr.msk.f32.vlgmr.msra.gmra.mrb[0].mxu1 %vm609_vm1, %v536_v55  ;;  %v901_v50 = vsel %vm883_vm2, %v899_v38, %v900_v40  ;;  %v906_v51 = vrot.slane %v549_v46, 1  ;;  %v599_v54 = vld [vmem:[%s2912_s10 + $0x8] sm:$0xff]  ;;  %v600_v55 = vld [vmem:[%s2912_s10 + $0x10] sm:$0xff]  ;;  %v602_v58 = vld [vmem:[%s2912_s10 + $0x20] sm:$0xff]  ;;  %v1787_v2 = vrot.slane %v2860_v10, 1  ;;  %v1793_v8 = vrot.slane %v2881_v22, 1 }
  0x24   : > { %2403 = vmatpush3.msk.msra.mxu1 %vm634_vm0, %v2743_v15  ;;  %2393 = vmatprep.mubr.msk.f32.mxu1 %vm609_vm1, %v538_v56  ;;  %v888_v15 = vrot.slane %v537_v9, 1  ;;  %v904_v52 = vsel %vm883_vm2, %v902_v42, %v903_v45  ;;  %v583_v59 = vld [vmem:[%s2836_s24 + $0x8] sm:$0x1]  ;;  %v597_v20 = vld [vmem:[%s2836_s24 + $0x78] sm:$0x1]  ;;  %v1805_v24 = vrot.slane %v2923_v47, 1 }
  0x25   : > { %2453 = vmatmul.mubr.msk.f32.gmra.mrb[4].mxu0 %vm609_vm1, %v1351_v57  ;;  %2416 = vmatprep.subr.msk.mxu1 %vm634_vm0, %v2223_v60  ;;  %v907_v56 = vsel %vm883_vm2, %v905_v49, %v906_v51  ;;  %v601_v57 = vld [vmem:[%s2912_s10 + $0x18] sm:$0xff]  ;;  %v579_v21 = vld [vmem:[%s2722_s27 + $0x28] sm:$0xff]  ;;  %v1806_v26 = vrot.slane %v597_v20, 1  ;;  %v2283_v36 = vld [vmem:[%s3051_s7] ss:$0 sm:$0xff] }
  0x26   : > { %2455 = vmatprep.mubr.msk.f32.mxu0 %vm609_vm1, %v1354_v61  ;;  %v889_v27 = vsel %vm883_vm2, %v887_v13, %v888_v15  ;;  %v1784_v61 = vrot.slane %v2850_v3, 1  ;;  %v595_v13 = vld [vmem:[%s2836_s24 + $0x68] sm:$0x1]  ;;  %v1799_v15 = vrot.slane %v2898_v35, 1 }
  0x27   : > { %2394 = vmatmul.mubr.msk.f32.gmra.mrb[2].mxu1 %vm609_vm1, %v540_v62  ;;  %v604_v62 = vld [vmem:[%s2912_s10 + $0x30] sm:$0xff]  ;;  %v1807_v29 = vsel %vm883_vm2, %v1805_v24, %v1806_v26 }
  0x28   : > { %2396 = vmatprep.mubr.msk.f32.mxu1 %vm609_vm1, %v542_v63  ;;  %v1785_v63 = vrot.slane %v583_v59, 1 }
  0x29   : > { %2456 = vmatmul.mubr.msk.f32.gmra.mrb[6].mxu0 %vm609_vm1, %v1357_v0  ;;  %v585_v0 = vld [vmem:[%s2836_s24 + $0x18] sm:$0x1] }
  0x2a   : > { %2460 = vmatprep.mubr.msk.f32.mxu0 %vm609_vm1, %v2850_v3  ;;  %v605_v3 = vld [vmem:[%s2912_s10 + $0x38] sm:$0xff] }
  0x2b   : > { %2397 = vmatmul.mubr.msk.f32.gmra.mrb[4].mxu1 %vm609_vm1, %v544_v4  ;;  %v1790_v4 = vrot.slane %v2865_v12, 1 }
  0x2c   : > { %2399 = vmatprep.mubr.msk.f32.mxu1 %vm609_vm1, %v546_v6  ;;  %v591_v6 = vld [vmem:[%s2836_s24 + $0x48] sm:$0x1] }
  0x2d   : > { %2461 = vmatmul.mubr.msk.f32.vlgmr.msra.gmra.mrb[0].mxu0 %vm609_vm1, %v2860_v10 }
  0x2e   : > { %2473 = vmatpush3.msk.msra.mxu0 %vm634_vm0, %v2790_v37  ;;  %2463 = vmatprep.mubr.msk.f32.mxu0 %vm609_vm1, %v2865_v12  ;;  %v2903_v37 = vld [vmem:[%s2836_s24 + $0x60] sm:$0xff]  ;;  %v1797_v12 = vrot.slane %v591_v6, 1 }
  0x2f   : > { %2400 = vmatmul.mubr.msk.f32.gmra.mrb[6].mxu1 %vm609_vm1, %v548_v14  ;;  %2486 = vmatprep.subr.msk.mxu0 %vm634_vm0, %v2273_v16  ;;  %v578_v14 = vld [vmem:[%s2722_s27 + $0x20] sm:$0xff]  ;;  %v1802_v17 = vrot.slane %v2903_v37, 1 }
  0x30   : > { %2404 = vmatprep.mubr.msk.f32.mxu1 %vm609_vm1, %v886_v19  ;;  %v1803_v19 = vrot.slane %v595_v13, 1 }
  0x31   : > { %2464 = vmatmul.mubr.msk.f32.gmra.mrb[2].mxu0 %vm609_vm1, %v2881_v22  ;;  %v580_v22 = vld [vmem:[%s2722_s27 + $0x30] sm:$0xff] }
  0x32   : > { %2466 = vmatprep.mubr.msk.f32.mxu0 %vm609_vm1, %v2886_v25 }
  0x33   : > { %2405 = vmatmul.mubr.msk.f32.vlgmr.msra.gmra.mrb[0].mxu1 %vm609_vm1, %v889_v27  ;;  %v581_v27 = vld [vmem:[%s2722_s27 + $0x38] sm:$0xff] }
  0x34   : > { %2417 = vmatpush3.msk.msra.mxu1 %vm634_vm0, %v2223_v60  ;;  %2407 = vmatprep.mubr.msk.f32.mxu1 %vm609_vm1, %v892_v32  ;;  %v603_v60 = vld [vmem:[%s2912_s10 + $0x28] sm:$0xff] }
  0x35   : > { %2467 = vmatmul.mubr.msk.f32.gmra.mrb[4].mxu0 %vm609_vm1, %v2898_v35  ;;  %2500 = vmatprep.subr.msk.mxu1 %vm634_vm0, %v2683_v1 }
  0x36   : > { %2469 = vmatprep.mubr.msk.f32.mxu0 %vm609_vm1, %v2903_v37 }
  0x37   : > { %2408 = vmatmul.mubr.msk.f32.gmra.mrb[2].mxu1 %vm609_vm1, %v895_v39 }
  0x38   : > { %2410 = vmatprep.mubr.msk.f32.mxu1 %vm609_vm1, %v898_v43 }
  0x39   : > { %2470 = vmatmul.mubr.msk.f32.gmra.mrb[6].mxu0 %vm609_vm1, %v2923_v47 }
  0x3a   : > { %2474 = vmatprep.mubr.msk.f32.mxu0 %vm609_vm1, %v598_v48 }
  0x3b   : > { %2411 = vmatmul.mubr.msk.f32.gmra.mrb[4].mxu1 %vm609_vm1, %v901_v50 }
  0x3c   : > { %2413 = vmatprep.mubr.msk.f32.mxu1 %vm609_vm1, %v904_v52 }
  0x3d   : > { %2475 = vmatmul.mubr.msk.f32.vlgmr.msra.gmra.mrb[0].mxu0 %vm609_vm1, %v599_v54 }
  0x3e   : > { %2487 = vmatpush3.msk.msra.mxu0 %vm634_vm0, %v2273_v16  ;;  %2477 = vmatprep.mubr.msk.f32.mxu0 %vm609_vm1, %v600_v55 }
  0x3f   : > { %2414 = vmatmul.mubr.msk.f32.gmra.mrb[6].mxu1 %vm609_vm1, %v907_v56 }
  0x40   : > { %2418 = vmatprep.mubr.msk.f32.mxu1 %vm609_vm1, %v2726_v7  ;;  %v587_v7 = vld [vmem:[%s2836_s24 + $0x28] sm:$0x1] }
  0x41   : > { %2478 = vmatmul.mubr.msk.f32.gmra.mrb[2].mxu0 %vm609_vm1, %v601_v57  ;;  %v1791_v5 = vrot.slane %v587_v7, 1 }
  0x42   : > { %2480 = vmatprep.mubr.msk.f32.mxu0 %vm609_vm1, %v602_v58 }
  0x43   : > { %2419 = vmatmul.mubr.msk.f32.vlgmr.msra.gmra.mrb[0].mxu1 %vm609_vm1, %v2749_v18  ;;  %v1788_v18 = vrot.slane %v585_v0, 1  ;;  %v1792_v11 = vsel %vm883_vm2, %v1790_v4, %v1791_v5 }
  0x44   : > { %2501 = vmatpush3.msk.msra.mxu1 %vm634_vm0, %v2683_v1  ;;  %2421 = vmatprep.mubr.msk.f32.mxu1 %vm609_vm1, %v2757_v23  ;;  %v1786_v1 = vsel %vm883_vm2, %v1784_v61, %v1785_v63  ;;  %v589_v23 = vld [vmem:[%s2836_s24 + $0x38] sm:$0x1] }
  0x45   : > { %2481 = vmatmul.mubr.msk.f32.gmra.mrb[4].mxu0 %vm609_vm1, %v603_v60  ;;  %v1789_v9 = vsel %vm883_vm2, %v1787_v2, %v1788_v18  ;;  %v1794_v10 = vrot.slane %v589_v23, 1 }
  0x46   : > { %2483 = vmatprep.mubr.msk.f32.mxu0 %vm609_vm1, %v604_v62 }
  0x47   : > { %2422 = vmatmul.mubr.msk.f32.gmra.mrb[2].mxu1 %vm609_vm1, %v2765_v28  ;;  %v1796_v28 = vrot.slane %v2886_v25, 1 }
  0x48   : > { %2424 = vmatprep.mubr.msk.f32.mxu1 %vm609_vm1, %v2773_v31  ;;  %v593_v31 = vld [vmem:[%s2836_s24 + $0x58] sm:$0x1] }
  0x49   : > { %2484 = vmatmul.mubr.msk.f32.gmra.mrb[6].mxu0 %vm609_vm1, %v605_v3  ;;  %v1800_v16 = vrot.slane %v593_v31, 1 }
  0x4a   : > { %2488 = vmatprep.mubr.msk.f32.mxu0 %vm609_vm1, %v1786_v1 }
  0x4b   : > { %2425 = vmatmul.mubr.msk.f32.gmra.mrb[4].mxu1 %vm609_vm1, %v2796_v41  ;;  %v1795_v41 = vsel %vm883_vm2, %v1793_v8, %v1794_v10  ;;  %v1801_v25 = vsel %vm883_vm2, %v1799_v15, %v1800_v16 }
  0x4c   : > { %2427 = vmatprep.mubr.msk.f32.mxu1 %vm609_vm1, %v2802_v44  ;;  %v1798_v44 = vsel %vm883_vm2, %v1796_v28, %v1797_v12 }
  0x4d   : > { %2489 = vmatmul.mubr.msk.f32.vlgmr.msra.gmra.mrb[0].mxu0 %vm609_vm1, %v1789_v9 }
  0x4e   : > { %2491 = vmatprep.mubr.msk.f32.mxu0 %vm609_vm1, %v1792_v11 }
  0x4f   : > { %2428 = vmatmul.mubr.msk.f32.gmra.mrb[6].mxu1 %vm609_vm1, %v2815_v53  ;;  %v1804_v53 = vsel %vm883_vm2, %v1802_v17, %v1803_v19 }
  0x50   : > { %2438 = vmatprep.mubr.msk.f32.mxu1 %vm609_vm1, %v578_v14 }
  0x51   : > { %2492 = vmatmul.mubr.msk.f32.gmra.mrb[2].mxu0 %vm609_vm1, %v1795_v41 }
  0x52   : > { %2494 = vmatprep.mubr.msk.f32.mxu0 %vm609_vm1, %v1798_v44 }
  0x53   : > { %2439 = vmatmul.mubr.msk.f32.vlgmr.msra.gmra.mrb[4].mxu1 %vm609_vm1, %v579_v21 }
  0x54   : > { %2441 = vmatprep.mubr.msk.f32.mxu1 %vm609_vm1, %v580_v22 }
  0x55   : > { %2495 = vmatmul.mubr.msk.f32.gmra.mrb[4].mxu0 %vm609_vm1, %v1801_v25 }
  0x56   : > { %2497 = vmatprep.mubr.msk.f32.mxu0 %vm609_vm1, %v1804_v53 }
  0x57   : > { %2442 = vmatmul.mubr.msk.f32.gmra.mrb[6].mxu1 %vm609_vm1, %v581_v27 }
  0x59   : > { %2498 = vmatmul.mubr.msk.f32.gmra.mrb[6].mxu0 %vm609_vm1, %v1807_v29 }
 0x116   : > { %v2420_v30 = vpop.f32.mrb[0].mxu1 }
 0x117   : > { %v1137_v32 = vpop.f32.mrb[1].mxu1 }
 0x11a   : > { %v2423_v33 = vpop.f32.mrb[2].mxu1 }
 0x11b   : > { %v1147_v34 = vpop.f32.mrb[3].mxu1 }
 0x120   : > { %v2490_v35 = vpop.f32.mrb[0].mxu0 }
 0x121   : > { %v2502_v37 = vadd.f32 %v2490_v35, %v2420_v30  ;;  %v1895_v38 = vpop.f32.mrb[1].mxu0 }
 0x122   : > { %v2503_v39 = vadd.f32 %v1895_v38, %v1137_v32 }
 0x123   : > { %v1950_v40 = vadd.f32 %v2502_v37, %v2283_v36 }
 0x124   : > { %v1949_v42 = vadd.f32 %v2503_v39, %v2283_v36  ;;  %v2493_v43 = vpop.f32.mrb[2].mxu0 }
 0x125   : > { %vm1958_vm3 = vcmp.ge.f32.partialorder %v1950_v40, 0.0  ;;  %v1966_v45 = vmul.f32 0.01, %v1950_v40  ;;  %v2504_v46 = vadd.f32 %v2493_v43, %v2423_v33  ;;  %v1905_v47 = vpop.f32.mrb[3].mxu0 }
 0x126   : > { %vm1957_vm4 = vcmp.ge.f32.partialorder %v1949_v42, 0.0  ;;  %v1965_v48 = vmul.f32 0.01, %v1949_v42  ;;  %v2505_v49 = vadd.f32 %v1905_v47, %v1147_v34  ;;  %v2440_v50 = vpop.f32.mrb[4].mxu1 }
 0x127   : > { %v1974_v51 = vsel %vm1958_vm3, %v1950_v40, %v1966_v45  ;;  %v1952_v52 = vadd.f32 %v2504_v46, %v2283_v36  ;;  %v1299_v54 = vpop.f32.mrb[5].mxu1 }
 0x128   : > { %1982 = vst.msk [vmem:[%s3017_s14 + $0x8] sm:$0xff] %vm609_vm1, %v1974_v51  ;;  %v1973_v55 = vsel %vm1957_vm4, %v1949_v42, %v1965_v48  ;;  %v1951_v56 = vadd.f32 %v2505_v49, %v2283_v36  ;;  %v2496_v57 = vpop.f32.mrb[4].mxu0 }
 0x129   : > { %1981 = vst.msk [vmem:[%s3017_s14] sm:$0xff] %vm609_vm1, %v1973_v55  ;;  %vm1960_vm5 = vcmp.ge.f32.partialorder %v1952_v52, 0.0  ;;  %v1968_v58 = vmul.f32 0.01, %v1952_v52  ;;  %v2506_v59 = vadd.f32 %v2496_v57, %v2440_v50  ;;  %v1915_v60 = vpop.f32.mrb[5].mxu0 }
 0x12a   : > { %vm1959_vm6 = vcmp.ge.f32.partialorder %v1951_v56, 0.0  ;;  %v1967_v61 = vmul.f32 0.01, %v1951_v56  ;;  %v2507_v62 = vadd.f32 %v1915_v60, %v1299_v54  ;;  %v2443_v63 = vpop.f32.mrb[6].mxu1 }
 0x12b   : > { %v1976_v0 = vsel %vm1960_vm5, %v1952_v52, %v1968_v58  ;;  %v1954_v7 = vadd.f32 %v2506_v59, %v2283_v36  ;;  %v1309_v2 = vpop.f32.mrb[7].mxu1 }
 0x12c   : > { %1984 = vst.msk [vmem:[%s3017_s14 + $0x18] sm:$0xff] %vm609_vm1, %v1976_v0  ;;  %v1975_v3 = vsel %vm1959_vm6, %v1951_v56, %v1967_v61  ;;  %v1953_v18 = vadd.f32 %v2507_v62, %v2283_v36  ;;  %v2499_v4 = vpop.f32.mrb[6].mxu0 }
 0x12d   : > { %1983 = vst.msk [vmem:[%s3017_s14 + $0x10] sm:$0xff] %vm609_vm1, %v1975_v3  ;;  %vm1962_vm7 = vcmp.ge.f32.partialorder %v1954_v7, 0.0  ;;  %v1970_v1 = vmul.f32 0.01, %v1954_v7  ;;  %v2508_v5 = vadd.f32 %v2499_v4, %v2443_v63  ;;  %v1925_v23 = vpop.f32.mrb[7].mxu0 }
 0x12e   : > { %vm1961_vm8 = vcmp.ge.f32.partialorder %v1953_v18, 0.0  ;;  %v1969_v6 = vmul.f32 0.01, %v1953_v18  ;;  %v2509_v8 = vadd.f32 %v1925_v23, %v1309_v2 }
 0x12f   : > { %v1978_v9 = vsel %vm1962_vm7, %v1954_v7, %v1970_v1  ;;  %v1956_v10 = vadd.f32 %v2508_v5, %v2283_v36 }
 0x130   : > { %1986 = vst.msk [vmem:[%s3017_s14 + $0x28] sm:$0xff] %vm609_vm1, %v1978_v9  ;;  %v1977_v28 = vsel %vm1961_vm8, %v1953_v18, %v1969_v6  ;;  %v1955_v11 = vadd.f32 %v2509_v8, %v2283_v36 }
 0x131   : > { %1985 = vst.msk [vmem:[%s3017_s14 + $0x20] sm:$0xff] %vm609_vm1, %v1977_v28  ;;  %vm1964_vm9 = vcmp.ge.f32.partialorder %v1956_v10, 0.0  ;;  %v1972_v12 = vmul.f32 0.01, %v1956_v10 }
 0x132   : > { %vm1963_vm10 = vcmp.ge.f32.partialorder %v1955_v11, 0.0  ;;  %v1971_v31 = vmul.f32 0.01, %v1955_v11 }
 0x133   : > { %v1980_v13 = vsel %vm1964_vm9, %v1956_v10, %v1972_v12 }
 0x134   : > { %1988 = vst.msk [vmem:[%s3017_s14 + $0x38] sm:$0xff] %vm609_vm1, %v1980_v13  ;;  %v1979_v14 = vsel %vm1963_vm10, %v1955_v11, %v1971_v31 }
 0x135   : > { %1987 = vst.msk [vmem:[%s3017_s14 + $0x30] sm:$0xff] %vm609_vm1, %v1979_v14 }
 0x136 PF: > { %s18_s29 = sadd.s32 1, %s2612_s29   ;;  %s3053_s27 = smov %s2608_s28 }
 0x137   : > { %p15_p5 = scmp.ge.s32.totalorder %s18_s29, 4   ;;  %s3054_s28 = smov %s3056_s30 }
 0x139   :  { %17 = sbr.rel (!%p15_p5) target bundleno = 2 (0x2), region = 105 }

</bundles_post_ra>
